<compile_context>
chip_gen: v6e
topology: v6e:2x2x1
jax: 0.10.0
libtpu: 0.0.40
codegen_flags: <defaults>
</compile_context>

<pallas_src>
import functools

import jax
import jax.numpy as jnp
from jax.experimental import pallas as pl
from jax.experimental.pallas import tpu as pltpu


def _round_up(x, m):
    return (x + m - 1) // m * m


def fm_kernel(lin_ref, o2_ref, x_ref, a1_ref, a2_ref, a3_ref,
              c1_ref, c2_ref, wlin_ref, blin_ref, out_ref):
    lin_sp = lin_ref[...]          # [F, TB]   gathered linear embeddings (batch on lanes)
    o2 = o2_ref[...]               # [F, E, TB] gathered order-2 embeddings
    xT = x_ref[...]                # [D, TB]   dense features, transposed
    a1 = a1_ref[...]               # [E, D]    w_d^T
    a2 = a2_ref[...]               # [E, D]    (w_d*w_d)^T
    a3 = a3_ref[...]               # [E, D]    2*(w_d*b_d)^T
    c1 = c1_ref[...]               # [E, 1]    sum_d b_d
    c2 = c2_ref[...]               # [E, 1]    sum_d b_d^2
    wlin = wlin_ref[...]           # [D, 1]    linear_dense weight (as a column)
    b_lin = blin_ref[0, 0]         # scalar    linear_dense bias (SMEM)

    # ---- linear part: sum of sparse linear embeddings + dense linear ---- [1, TB]
    lin = (jnp.sum(lin_sp, axis=0, keepdims=True)
           + jnp.sum(xT * wlin, axis=0, keepdims=True)
           + b_lin)

    # ---- sparse order-2 sums over fields ---- [E, TB]
    s_sp = jnp.sum(o2, axis=0)
    q_sp = jnp.sum(o2 * o2, axis=0)

    # ---- dense order-2 sums, closed form (MXU) ---- [E, TB]
    s_de = jnp.dot(a1, xT, preferred_element_type=jnp.float32) + c1
    q_de = (jnp.dot(a2, xT * xT, preferred_element_type=jnp.float32)
            + jnp.dot(a3, xT, preferred_element_type=jnp.float32)
            + c2)

    # ---- FM interaction: 0.5 * sum_e[(sum v)^2 - sum v^2] ---- [1, TB]
    s = s_sp + s_de
    q = q_sp + q_de
    cross = 0.5 * jnp.sum(s * s - q, axis=0, keepdims=True)

    out_ref[...] = lin + cross


def fm_forward(params, x_sparse, x_dense):
    """FM forward. x_sparse: [B, F] int32, x_dense: [B, D] float32 -> [B, 1]."""
    B, F = x_sparse.shape
    D = x_dense.shape[1]
    E = params["o2_emb"][0].shape[1]

    # Batch tile: multiple of 128 (lane-dense), capped so VMEM stays tiny even
    # on v7x's 64 MiB (per-block footprint ~ 2 * TB * (F*E + F + D + 1) * 4 B).
    TB = min(512, _round_up(B, 128))
    B_pad = _round_up(B, TB)
    nb = pl.cdiv(B_pad, TB)
    pad = B_pad - B

    # --- embedding gathers (JAX glue), laid out with batch on the lane axis ---
    lin_T = jnp.stack(
        [params["lin_emb"][i][x_sparse[:, i], 0] for i in range(F)], axis=0
    ).astype(jnp.float32)                                               # [F, B]
    o2_T = jnp.stack(
        [params["o2_emb"][i][x_sparse[:, i]].T for i in range(F)], axis=0
    ).astype(jnp.float32)                                               # [F, E, B]
    x_T = x_dense.T.astype(jnp.float32)                                 # [D, B]
    if pad:
        lin_T = jnp.pad(lin_T, ((0, 0), (0, pad)))
        o2_T = jnp.pad(o2_T, ((0, 0), (0, 0), (0, pad)))
        x_T = jnp.pad(x_T, ((0, 0), (0, pad)))

    # --- precomputed small constants for the closed-form dense order-2 term ---
    w_d = params["w_d"].astype(jnp.float32)     # [D, E]
    b_d = params["b_d"].astype(jnp.float32)     # [D, E]
    a1 = w_d.T                                  # [E, D]
    a2 = (w_d * w_d).T                          # [E, D]
    a3 = (2.0 * w_d * b_d).T                    # [E, D]
    c1 = jnp.sum(b_d, axis=0)[:, None]          # [E, 1]
    c2 = jnp.sum(b_d * b_d, axis=0)[:, None]    # [E, 1]
    wlin_col = params["w_lin"].reshape(D, 1).astype(jnp.float32)   # [D, 1]
    b_lin = params["b_lin"].reshape(1, 1).astype(jnp.float32)      # [1, 1] -> SMEM

    out = pl.pallas_call(
        fm_kernel,
        out_shape=jax.ShapeDtypeStruct((1, B_pad), jnp.float32),
        grid=(nb,),
        in_specs=[
            pl.BlockSpec((F, TB), lambda i: (0, i)),          # lin_T
            pl.BlockSpec((F, E, TB), lambda i: (0, 0, i)),    # o2_T
            pl.BlockSpec((D, TB), lambda i: (0, i)),          # x_T
            pl.BlockSpec((E, D), lambda i: (0, 0)),           # a1
            pl.BlockSpec((E, D), lambda i: (0, 0)),           # a2
            pl.BlockSpec((E, D), lambda i: (0, 0)),           # a3
            pl.BlockSpec((E, 1), lambda i: (0, 0)),           # c1
            pl.BlockSpec((E, 1), lambda i: (0, 0)),           # c2
            pl.BlockSpec((D, 1), lambda i: (0, 0)),           # wlin_col
            pl.BlockSpec(memory_space=pltpu.MemorySpace.SMEM),  # b_lin scalar
        ],
        out_specs=pl.BlockSpec((1, TB), lambda i: (0, i)),    # lane-dense output
        compiler_params=pltpu.CompilerParams(
            dimension_semantics=("parallel",),
            vmem_limit_bytes=32 * 1024 * 1024,
        ),
    )(lin_T, o2_T, x_T, a1, a2, a3, c1, c2, wlin_col, b_lin)

    return out[0, :B][:, None]                                # [B, 1]


def init_params(key, sparse_dims, dense_dim, embed_dim):
    keys = jax.random.split(key, 2 * len(sparse_dims) + 4)
    ki = iter(keys)
    lin_emb = [jax.random.normal(next(ki), (v, 1), jnp.float32) for v in sparse_dims]
    o2_emb = [jax.random.normal(next(ki), (v, embed_dim), jnp.float32)
              for v in sparse_dims]
    w_lin = 0.1 * jax.random.normal(next(ki), (1, dense_dim), jnp.float32)
    b_lin = 0.1 * jax.random.normal(next(ki), (1, 1), jnp.float32)
    w_d = 0.1 * jax.random.normal(next(ki), (dense_dim, embed_dim), jnp.float32)
    b_d = 0.1 * jax.random.normal(next(ki), (dense_dim, embed_dim), jnp.float32)
    return {"lin_emb": lin_emb, "o2_emb": o2_emb,
            "w_lin": w_lin, "b_lin": b_lin, "w_d": w_d, "b_d": b_d}


def fm_reference(params, x_sparse, x_dense):
    """Pure-JAX reference mirroring the PyTorch forward exactly."""
    F = x_sparse.shape[1]
    lin = sum(params["lin_emb"][i][x_sparse[:, i]] for i in range(F))       # [B, 1]
    lin = lin + x_dense @ params["w_lin"].T + params["b_lin"]               # [B, 1]
    o2_sparse = jnp.stack([params["o2_emb"][i][x_sparse[:, i]]
                           for i in range(F)], axis=1)                      # [B, F, E]
    dense_emb = (x_dense[:, :, None] * params["w_d"][None]
                 + params["b_d"][None])                                     # [B, D, E]
    o2 = jnp.concatenate([o2_sparse, dense_emb], axis=1)                    # [B, F+D, E]
    sq_of_sum = jnp.sum(o2, axis=1) ** 2
    sum_of_sq = jnp.sum(o2 ** 2, axis=1)
    cross = 0.5 * jnp.sum(sq_of_sum - sum_of_sq, axis=1, keepdims=True)
    return lin + cross


if __name__ == "__main__":
    sparse_dims = [10, 20, 30]   # 3 sparse fields
    dense_dim = 4
    embed_dim = 8
    batch = 8

    key = jax.random.PRNGKey(0)
    kp, ks, kd = jax.random.split(key, 3)
    params = init_params(kp, sparse_dims, dense_dim, embed_dim)

    x_sparse = jnp.stack(
        [jax.random.randint(jax.random.fold_in(ks, i), (batch,), 0, v)
         for i, v in enumerate(sparse_dims)], axis=1).astype(jnp.int32)     # [B, F]
    x_dense = jax.random.normal(kd, (batch, dense_dim), jnp.float32)        # [B, D]

    out = fm_forward(params, x_sparse, x_dense)
    out = jax.block_until_ready(out)

    ref = fm_reference(params, x_sparse, x_dense)
    assert out.shape == (batch, 1)
    assert jnp.allclose(out, ref, atol=1e-4, rtol=1e-4), (out, ref)

    print("KERNEL_OK")
</pallas_src>

<mosaic_0001>
module attributes {stable_mosaic.version = 11 : i64} {
  func.func @fm_kernel(%arg0: i32, %arg1: memref<3x128xf32, #tpu.memory_space<vmem>>, %arg2: memref<3x8x128xf32, #tpu.memory_space<vmem>>, %arg3: memref<4x128xf32, #tpu.memory_space<vmem>>, %arg4: memref<8x4xf32, #tpu.memory_space<vmem>>, %arg5: memref<8x4xf32, #tpu.memory_space<vmem>>, %arg6: memref<8x4xf32, #tpu.memory_space<vmem>>, %arg7: memref<8x1xf32, #tpu.memory_space<vmem>>, %arg8: memref<8x1xf32, #tpu.memory_space<vmem>>, %arg9: memref<4x1xf32, #tpu.memory_space<vmem>>, %arg10: memref<1x1xf32, #tpu.memory_space<smem>>, %arg11: memref<1x128xf32, #tpu.memory_space<vmem>>) attributes {dimension_semantics = [#tpu.dimension_semantics<parallel>], iteration_bounds = array<i64: 1>, scalar_prefetch = 0 : i64, scratch_operands = 0 : i64, tpu.core_type = #tpu.core_type<tc>, window_params = [{transform_indices = @transform_0, window_bounds = array<i64: 3, 128>}, {transform_indices = @transform_1, window_bounds = array<i64: 3, 8, 128>}, {transform_indices = @transform_2, window_bounds = array<i64: 4, 128>}, {pipeline_mode = #tpu.pipeline_mode<synchronous>, transform_indices = @transform_3, window_bounds = array<i64: 8, 4>}, {pipeline_mode = #tpu.pipeline_mode<synchronous>, transform_indices = @transform_4, window_bounds = array<i64: 8, 4>}, {pipeline_mode = #tpu.pipeline_mode<synchronous>, transform_indices = @transform_5, window_bounds = array<i64: 8, 4>}, {pipeline_mode = #tpu.pipeline_mode<synchronous>, transform_indices = @transform_6, window_bounds = array<i64: 8, 1>}, {pipeline_mode = #tpu.pipeline_mode<synchronous>, transform_indices = @transform_7, window_bounds = array<i64: 8, 1>}, {pipeline_mode = #tpu.pipeline_mode<synchronous>, transform_indices = @transform_8, window_bounds = array<i64: 4, 1>}, {transform_indices = @transform_9, window_bounds = array<i64: 1, 1>}, {transform_indices = @transform_10, window_bounds = array<i64: 1, 128>}]} {
    %c0 = arith.constant 0 : index
    %c0_0 = arith.constant 0 : index
    %0 = vector.load %arg1[%c0, %c0_0] : memref<3x128xf32, #tpu.memory_space<vmem>>, vector<3x128xf32>
    %c0_1 = arith.constant 0 : index
    %c0_2 = arith.constant 0 : index
    %c0_3 = arith.constant 0 : index
    %1 = vector.load %arg2[%c0_1, %c0_2, %c0_3] : memref<3x8x128xf32, #tpu.memory_space<vmem>>, vector<3x8x128xf32>
    %c0_4 = arith.constant 0 : index
    %c0_5 = arith.constant 0 : index
    %2 = vector.load %arg3[%c0_4, %c0_5] : memref<4x128xf32, #tpu.memory_space<vmem>>, vector<4x128xf32>
    %c0_6 = arith.constant 0 : index
    %c0_7 = arith.constant 0 : index
    %3 = vector.load %arg4[%c0_6, %c0_7] : memref<8x4xf32, #tpu.memory_space<vmem>>, vector<8x4xf32>
    %c0_8 = arith.constant 0 : index
    %c0_9 = arith.constant 0 : index
    %4 = vector.load %arg5[%c0_8, %c0_9] : memref<8x4xf32, #tpu.memory_space<vmem>>, vector<8x4xf32>
    %c0_10 = arith.constant 0 : index
    %c0_11 = arith.constant 0 : index
    %5 = vector.load %arg6[%c0_10, %c0_11] : memref<8x4xf32, #tpu.memory_space<vmem>>, vector<8x4xf32>
    %c0_12 = arith.constant 0 : index
    %c0_13 = arith.constant 0 : index
    %6 = vector.load %arg7[%c0_12, %c0_13] : memref<8x1xf32, #tpu.memory_space<vmem>>, vector<8x1xf32>
    %c0_14 = arith.constant 0 : index
    %c0_15 = arith.constant 0 : index
    %7 = vector.load %arg8[%c0_14, %c0_15] : memref<8x1xf32, #tpu.memory_space<vmem>>, vector<8x1xf32>
    %c0_16 = arith.constant 0 : index
    %c0_17 = arith.constant 0 : index
    %8 = vector.load %arg9[%c0_16, %c0_17] : memref<4x1xf32, #tpu.memory_space<vmem>>, vector<4x1xf32>
    %c0_18 = arith.constant 0 : index
    %c0_19 = arith.constant 0 : index
    %9 = memref.load %arg10[%c0_18, %c0_19] : memref<1x1xf32, #tpu.memory_space<smem>>
    %cst = arith.constant dense<0.000000e+00> : vector<128xf32>
    %10 = vector.multi_reduction <add>, %0, %cst [0] : vector<3x128xf32> to vector<128xf32>
    %11 = vector.shape_cast %10 : vector<128xf32> to vector<1x128xf32>
    %12 = vector.broadcast %8 : vector<4x1xf32> to vector<4x128xf32>
    %13 = arith.mulf %2, %12 : vector<4x128xf32>
    %cst_20 = arith.constant dense<0.000000e+00> : vector<128xf32>
    %14 = vector.multi_reduction <add>, %13, %cst_20 [0] : vector<4x128xf32> to vector<128xf32>
    %15 = vector.shape_cast %14 : vector<128xf32> to vector<1x128xf32>
    %16 = arith.addf %11, %15 : vector<1x128xf32>
    %17 = vector.broadcast %9 : f32 to vector<1x128xf32>
    %18 = arith.addf %16, %17 : vector<1x128xf32>
    %cst_21 = arith.constant dense<0.000000e+00> : vector<8x128xf32>
    %19 = vector.multi_reduction <add>, %1, %cst_21 [0] : vector<3x8x128xf32> to vector<8x128xf32>
    %20 = arith.mulf %1, %1 : vector<3x8x128xf32>
    %cst_22 = arith.constant dense<0.000000e+00> : vector<8x128xf32>
    %21 = vector.multi_reduction <add>, %20, %cst_22 [0] : vector<3x8x128xf32> to vector<8x128xf32>
    %cst_23 = arith.constant dense<0.000000e+00> : vector<8x128xf32>
    %22 = tpu.matmul %3, %2, %cst_23 {dimension_numbers = #tpu.dot_dimension_numbers<[1], [0], [0], [1], [0, 0, 1, 1], [], []>} : vector<8x4xf32>, vector<4x128xf32>, vector<8x128xf32> -> vector<8x128xf32>
    %23 = vector.broadcast %6 : vector<8x1xf32> to vector<8x128xf32>
    %24 = arith.addf %22, %23 : vector<8x128xf32>
    %25 = arith.mulf %2, %2 : vector<4x128xf32>
    %cst_24 = arith.constant dense<0.000000e+00> : vector<8x128xf32>
    %26 = tpu.matmul %4, %25, %cst_24 {dimension_numbers = #tpu.dot_dimension_numbers<[1], [0], [0], [1], [0, 0, 1, 1], [], []>} : vector<8x4xf32>, vector<4x128xf32>, vector<8x128xf32> -> vector<8x128xf32>
    %cst_25 = arith.constant dense<0.000000e+00> : vector<8x128xf32>
    %27 = tpu.matmul %5, %2, %cst_25 {dimension_numbers = #tpu.dot_dimension_numbers<[1], [0], [0], [1], [0, 0, 1, 1], [], []>} : vector<8x4xf32>, vector<4x128xf32>, vector<8x128xf32> -> vector<8x128xf32>
    %28 = arith.addf %26, %27 : vector<8x128xf32>
    %29 = vector.broadcast %7 : vector<8x1xf32> to vector<8x128xf32>
    %30 = arith.addf %28, %29 : vector<8x128xf32>
    %31 = arith.addf %19, %24 : vector<8x128xf32>
    %32 = arith.addf %21, %30 : vector<8x128xf32>
    %33 = arith.mulf %31, %31 : vector<8x128xf32>
    %34 = arith.subf %33, %32 : vector<8x128xf32>
    %cst_26 = arith.constant dense<0.000000e+00> : vector<128xf32>
    %35 = vector.multi_reduction <add>, %34, %cst_26 [0] : vector<8x128xf32> to vector<128xf32>
    %36 = vector.shape_cast %35 : vector<128xf32> to vector<1x128xf32>
    %cst_27 = arith.constant 5.000000e-01 : f32
    %37 = vector.broadcast %cst_27 : f32 to vector<1x128xf32>
    %38 = arith.mulf %37, %36 : vector<1x128xf32>
    %39 = arith.addf %18, %38 : vector<1x128xf32>
    %c0_28 = arith.constant 0 : index
    %c0_29 = arith.constant 0 : index
    %40 = vector.load %arg11[%c0_28, %c0_29] : memref<1x128xf32, #tpu.memory_space<vmem>>, vector<1x128xf32>
    tpu.vector_store %arg11[%c0_28, %c0_29], %39 {strides = array<i32>} : memref<1x128xf32, #tpu.memory_space<vmem>>, vector<1x128xf32>,
    return
  }
  func.func @transform_0(%arg0: i32) -> (i32, i32) {
    %c0_i32 = arith.constant 0 : i32
    %c0_i32_0 = arith.constant 0 : i32
    return %c0_i32, %arg0 : i32, i32
  }
  func.func @transform_1(%arg0: i32) -> (i32, i32, i32) {
    %c0_i32 = arith.constant 0 : i32
    %c0_i32_0 = arith.constant 0 : i32
    %c0_i32_1 = arith.constant 0 : i32
    return %c0_i32, %c0_i32_0, %arg0 : i32, i32, i32
  }
  func.func @transform_2(%arg0: i32) -> (i32, i32) {
    %c0_i32 = arith.constant 0 : i32
    %c0_i32_0 = arith.constant 0 : i32
    return %c0_i32, %arg0 : i32, i32
  }
  func.func @transform_3(%arg0: i32) -> (i32, i32) {
    %c0_i32 = arith.constant 0 : i32
    %c0_i32_0 = arith.constant 0 : i32
    %c0_i32_1 = arith.constant 0 : i32
    return %c0_i32, %c0_i32_0 : i32, i32
  }
  func.func @transform_4(%arg0: i32) -> (i32, i32) {
    %c0_i32 = arith.constant 0 : i32
    %c0_i32_0 = arith.constant 0 : i32
    %c0_i32_1 = arith.constant 0 : i32
    return %c0_i32, %c0_i32_0 : i32, i32
  }
  func.func @transform_5(%arg0: i32) -> (i32, i32) {
    %c0_i32 = arith.constant 0 : i32
    %c0_i32_0 = arith.constant 0 : i32
    %c0_i32_1 = arith.constant 0 : i32
    return %c0_i32, %c0_i32_0 : i32, i32
  }
  func.func @transform_6(%arg0: i32) -> (i32, i32) {
    %c0_i32 = arith.constant 0 : i32
    %c0_i32_0 = arith.constant 0 : i32
    %c0_i32_1 = arith.constant 0 : i32
    return %c0_i32, %c0_i32_0 : i32, i32
  }
  func.func @transform_7(%arg0: i32) -> (i32, i32) {
    %c0_i32 = arith.constant 0 : i32
    %c0_i32_0 = arith.constant 0 : i32
    %c0_i32_1 = arith.constant 0 : i32
    return %c0_i32, %c0_i32_0 : i32, i32
  }
  func.func @transform_8(%arg0: i32) -> (i32, i32) {
    %c0_i32 = arith.constant 0 : i32
    %c0_i32_0 = arith.constant 0 : i32
    %c0_i32_1 = arith.constant 0 : i32
    return %c0_i32, %c0_i32_0 : i32, i32
  }
  func.func @transform_9(%arg0: i32) -> (i32, i32) {
    %c0_i32 = arith.constant 0 : i32
    %c0_i32_0 = arith.constant 0 : i32
    %c0_i32_1 = arith.constant 0 : i32
    return %c0_i32, %c0_i32_0 : i32, i32
  }
  func.func @transform_10(%arg0: i32) -> (i32, i32) {
    %c0_i32 = arith.constant 0 : i32
    %c0_i32_0 = arith.constant 0 : i32
    return %c0_i32, %arg0 : i32, i32
  }
}

</mosaic_0001>

<bundles_post_ra>
// kernel: tpu_custom_call.1
= control target key start
LH: loop header
LB: loop body
LE: loop exit
PB: predicated region body
PF: predicated region fallthrough
CT: control target
= control target key end

     0   :  { %vm63_vm0 = vcmask 1043456   ;;  %v401_v2 = vmov 0.0   ;;  %vm402_vm1 = vmmov 0   ;;  %vm86_vm2 = vcmask 31744   ;;  %s506_s0 = inlined_call_operand.vmem [shape: f32[3,128], index: 0, kind: input, shape index: {}]   ;;  %s507_s1 = inlined_call_operand.vmem [shape: f32[3,8,128], index: 1, kind: input, shape index: {}]   ;;  %s508_s2 = inlined_call_operand.vmem [shape: f32[4,128], index: 2, kind: input, shape index: {}]   ;;  %s509_s3 = inlined_call_operand.vmem [shape: f32[8,4], index: 3, kind: input, shape index: {}]   ;;  %s510_s4 = inlined_call_operand.vmem [shape: f32[8,4], index: 4, kind: input, shape index: {}]   ;;  %s511_s5 = inlined_call_operand.vmem [shape: f32[8,4], index: 5, kind: input, shape index: {}]   ;;  %s512_s6 = inlined_call_operand.vmem [shape: f32[8,1], index: 6, kind: input, shape index: {}]   ;;  %s513_s7 = inlined_call_operand.vmem [shape: f32[8,1], index: 7, kind: input, shape index: {}]   ;;  %s514_s8 = inlined_call_operand.vmem [shape: f32[4,1], index: 8, kind: input, shape index: {}]   ;;  %s515_s9 = inlined_call_operand.<no memory space> [shape: f32[1,1], index: 9, kind: input, shape index: {}]   ;;  %s516_s10 = inlined_call_operand.hbm [shape: f32[1,128], index: 10, kind: output, shape index: {}]  }
   0x1   :  { %v41_v0 = vld [vmem:[%s508_s2] sm:$0xf]  ;;  %358 = vmatprep.subr.mxu0 %v401_v2  ;;  %360 = vmatprep.mubr.msk.f32.mxu0 %vm402_vm1, %v401_v2 }
   0x2   :  { %v42_v1 = vld [vmem:[%s509_s3] sm:$0xff]  ;;  %v163_v3 = vmul.f32 %v41_v0, %v41_v0  ;;  %359 = vmatpush3.msk.msra.mxu0 %vm63_vm0, %v41_v0  ;;  %363 = vmatprep.subr.mxu1 %v401_v2 }
   0x3   :  { %361 = vmatmul.mubr.msk.f32.vlgmr.msra.gmra.mxu0 %vm86_vm2, %v42_v1  ;;  %368 = vmatprep.subr.mxu0 %v401_v2  ;;  %v44_v4 = vld [vmem:[%s511_s5] sm:$0xff] }
   0x4   :  { %16 = vsyncpa [#allocation4], 0  ;;  %369 = vmatpush3.msk.msra.mxu0 %vm63_vm0, %v163_v3  ;;  %364 = vmatpush3.msk.msra.mxu1 %vm63_vm0, %v41_v0  ;;  %v43_v5 = vld [vmem:[%s510_s4] sm:$0xff]  ;;  %v403_v7 = vmov 0   ;;  %vm49_vm3 = vcmask 1042432   ;;  %v39_v14 = vld [vmem:[%s507_s1 + $0x8] sm:$0xff]  ;;  %v72_v58 = vstv %s515_s9 }
   0x5   :  { %v45_v6 = vld [vmem:[%s512_s6] sm:$0xff]  ;;  %365 = vmatprep.mubr.msk.f32.mxu1 %vm402_vm1, %v401_v2  ;;  %370 = vmatprep.mubr.msk.f32.mxu0 %vm402_vm1, %v401_v2  ;;  %v77_v18 = vmul.f32 %v39_v14, %v39_v14  ;;  %v40_v22 = vld [vmem:[%s507_s1 + $0x10] sm:$0xff]  ;;  %s404_s28 = smov [#allocation3]  }
   0x6   :  { %366 = vmatmul.mubr.msk.f32.vlgmr.msra.gmra.mxu1 %vm86_vm2, %v44_v4  ;;  %377 = vset.pattern.permute.xlu0 %v403_v7  ;;  %v47_v8 = vld [vmem:[%s514_s8] sm:$0xf]  ;;  %v78_v24 = vmul.f32 %v40_v22, %v40_v22  ;;  %s338_s29 = sshll.u32 %s404_s28, 4  ;;  %s339_s29 = int_to_ptr.vmem [resolvable:$true] %s338_s29 }
   0x7   :  { %371 = vmatmul.mubr.msk.f32.vlgmr.msra.gmra.mxu0 %vm86_vm2, %v43_v5  ;;  %83 = vperm.xlu0 %377, %v45_v6   ;;  %v46_v9 = vld [vmem:[%s513_s7] sm:$0xff]  ;;  %s379_s30 = scalar_lea.vmem %s339_s29, 16  ;;  %s383_s11 = scalar_lea.vmem %s339_s29, 32 }
   0x8   :  { %378 = vset.pattern.permute.xlu1 %v403_v7  ;;  %v37_v12 = vld [vmem:[%s506_s0] sm:$0x7]  ;;  %p380_p0 = scmp.ne.s32.totalorder %s339_s29, %s379_s30  ;;  %p384_p1 = scmp.lt.s32.totalorder %s339_s29, %s339_s29 }
   0x9   :  { %59 = vperm.xlu1 %378, %v47_v8   ;;  %v38_v13 = vld [vmem:[%s507_s1] sm:$0xff]  ;;  %v50_v16 = vsel %vm49_vm3, %v37_v12, 0.0  ;;  %p385_p2 = scmp.lt.s32.totalorder %s383_s11, %s379_s30 }
   0xa   :  { %v76_v17 = vmul.f32 %v38_v13, %v38_v13  ;;  %v74_v19 = vadd.f32 %v39_v14, %v38_v13  ;;  %v51_v21 = vrot.slane %v50_v16, 4 }
   0xb   :  { %315 = vperm.xlu0 %377, %v46_v9   ;;  %p386_p3 = por %p385_p2, %p384_p1 }
   0xc   :  { %v79_v26 = vadd.f32 %v77_v18, %v76_v17  ;;  %v75_v27 = vadd.f32 %v74_v19, %v40_v22  ;;  %v52_v30 = vadd.f32 %v51_v21, %v50_v16 }
   0xd   :  { %p387_p4 = pnand %p386_p3, %p380_p0 }
   0xe   :  { %v80_v33 = vadd.f32 %v79_v26, %v78_v24  ;;  %v53_v39 = vrot.slane %v52_v30, 2 }
  0x10   :  { %v54_v46 = vadd.f32 %v53_v39, %v52_v30 }
  0x12   :  { %v55_v50 = vrot.slane %v54_v46, 1 }
  0x14   :  { %v56_v53 = vadd.f32 %v55_v50, %v54_v46 }
  0x82   :  { %v84_v23 = vpop.permute.xlu0 %83 }
  0x84   :  { %v60_v10 = vpop.permute.xlu1 %59 }
  0x85   :  { %v62_v11 = vmul.f32 %v60_v10, %v41_v0 }
  0x86   :  { %v316_v40 = vpop.permute.xlu0 %315 }
  0x87   :  { %v64_v15 = vsel %vm63_vm0, %v62_v11, 0.0 }
  0x88   :  { %v65_v20 = vrot.slane %v64_v15, 4 }
  0x8a   :  { %v66_v29 = vadd.f32 %v65_v20, %v64_v15 }
  0x8c   :  { %v67_v36 = vrot.slane %v66_v29, 2 }
  0x8e   :  { %v68_v44 = vadd.f32 %v67_v36, %v66_v29 }
  0x90   :  { %v69_v48 = vrot.slane %v68_v44, 1 }
  0x92   :  { %v70_v52 = vadd.f32 %v69_v48, %v68_v44 }
  0x94   :  { %v71_v56 = vadd.f32 %v70_v52, %v56_v53 }
  0x96   :  { %v73_v60 = vadd.f32 %v72_v58, %v71_v56 }
  0xc3   :  { %v159_v25 = vpop.f32.mrf.mxu0 }
  0xc4   :  { %v160_v28 = vadd.f32 %v159_v25, %v84_v23 }
  0xc5   :  { %v362_v31 = vpop.f32.mrf.mxu0 }
  0xc6   :  { %v233_v32 = vpop.f32.mrf.mxu1  ;;  %v319_v35 = vadd.f32 %v160_v28, %v75_v27 }
  0xc7   :  { %v309_v34 = vpop.f32.mrf.mxu0 }
  0xc8   :  { %v310_v37 = vadd.f32 %v309_v34, %v233_v32  ;;  %v367_v38 = vpop.f32.mrf.mxu1  ;;  %v321_v43 = vmul.f32 %v319_v35, %v319_v35 }
  0xc9   :  { %v372_v41 = vpop.f32.mrf.mxu0 }
  0xca   :  { %v318_v42 = vadd.f32 %v316_v40, %v310_v37 }
  0xcc   :  { %v320_v45 = vadd.f32 %v318_v42, %v80_v33 }
  0xce   :  { %v322_v47 = vsub.f32 %v321_v43, %v320_v45 }
  0xd0   :  { %v323_v49 = vrot.slane %v322_v47, 4 }
  0xd2   :  { %v324_v51 = vadd.f32 %v323_v49, %v322_v47 }
  0xd4   :  { %v325_v54 = vrot.slane %v324_v51, 2 }
  0xd6   :  { %v326_v55 = vadd.f32 %v325_v54, %v324_v51 }
  0xd8   :  { %v327_v57 = vrot.slane %v326_v55, 1 }
  0xda   :  { %v328_v59 = vadd.f32 %v327_v57, %v326_v55 }
  0xdc   :  { %v329_v61 = vmul.f32 0.5, %v328_v59 }
  0xde   :  { %v330_v62 = vadd.f32 %v329_v61, %v73_v60 }
  0xe0   :  { %331 = vst [vmem:[#allocation3] sm:$0x1] %v330_v62 }
  0xe1   :  { %390 = shalt.err (!%p387_p4)
}
  0xe2   :  { %341 = dma.vmem_to_hbm [thread:$0]  %s339_s29, 16, %s516_s10, [#allocation4]  }
  0xe3   :  { %399 = dma.done.wait [#allocation4], 16  }
  0xe4   :  { %400 = vsyncadd [#allocation4], 4294967280 }
  0xe5   :  { %345 = vsyncpa [#allocation4], 1 }

</bundles_post_ra>
